<compile_context>
chip_gen: v7x
topology: tpu7x:2x2x1
jax: 0.10.0
libtpu: 0.0.40
codegen_flags: <defaults>
</compile_context>

<pallas_src>
import functools
import math

import jax
import jax.numpy as jnp
from jax import lax
from jax.experimental import pallas as pl
from jax.experimental.pallas import tpu as pltpu


def _mhsa_kernel(xq_ref, xkv_ref, wq_ref, wkv_ref, wo_ref,
                 bq_ref, bkv_ref, bo_ref, o_ref,
                 *, num_heads, head_dim, approx_recip):
    E = num_heads * head_dim
    xq = xq_ref[0]                      # (tq, E) compute dtype (f32 or bf16)
    xkv = xkv_ref[0]                    # (S,  E)
    cdt = xq.dtype

    # ---- fused projections: big lane-dense MXU matmuls, f32 accumulation ----
    q = jnp.dot(xq, wq_ref[...], preferred_element_type=jnp.float32) + bq_ref[...]      # (tq, E)
    kv = jnp.dot(xkv, wkv_ref[...], preferred_element_type=jnp.float32) + bkv_ref[...]  # (S, 2E)

    q = q.astype(cdt)
    k = kv[:, :E].astype(cdt)
    v = kv[:, E:].astype(cdt)

    scale = 1.0 / math.sqrt(head_dim)

    out_acc = None
    for h in range(num_heads):          # static unroll over heads (H is small)
        sl = slice(h * head_dim, (h + 1) * head_dim)
        qh = q[:, sl]                   # (tq, Dh)
        kh = k[:, sl]                   # (S,  Dh)
        vh = v[:, sl]                   # (S,  Dh)

        # QK^T without materializing a transpose: contract last dims directly.
        s = lax.dot_general(qh, kh, (((1,), (1,)), ((), ())),
                            preferred_element_type=jnp.float32) * scale      # (tq, S) f32

        m = jnp.max(s, axis=-1, keepdims=True)
        p = jnp.exp(s - m)
        l = jnp.sum(p, axis=-1, keepdims=True)                               # (tq, 1)

        # Unnormalized PV matmul, then fold 1/l in afterwards (Dh cols << S cols).
        oh = jnp.dot(p.astype(cdt), vh, preferred_element_type=jnp.float32)  # (tq, Dh)
        oh = oh * pl.reciprocal(l, approx=approx_recip)

        # Fold head h directly into the output projection (no concatenate).
        contrib = jnp.dot(oh.astype(cdt), wo_ref[h],
                          preferred_element_type=jnp.float32)                # (tq, E)
        out_acc = contrib if out_acc is None else out_acc + contrib

    out = out_acc + bo_ref[...]
    o_ref[0] = out.astype(o_ref.dtype)


def _choose_q_tile(seq_len, max_tile=512):
    if seq_len <= max_tile:
        return seq_len
    for t in (512, 256, 128, 64, 32, 16, 8):
        if t <= max_tile and seq_len % t == 0:
            return t
    return seq_len


def multi_head_self_attention(x, params, *, num_heads):
    B, S, E = x.shape
    assert E % num_heads == 0, "embed_dim must be divisible by num_heads"
    head_dim = E // num_heads
    wq, bq, wk, bk, wv, bv, wo, bo = params

    cdt = x.dtype
    # Weights in the compute dtype (bf16 stays bf16 for full-rate MXU);
    # biases in f32 so they add directly onto the f32 accumulators.
    wq_c = wq.astype(cdt)
    wkv_c = jnp.concatenate([wk, wv], axis=1).astype(cdt)             # (E, 2E)
    wo_c = wo.reshape(num_heads, head_dim, E).astype(cdt)             # (H, Dh, E)
    bq_f = bq.astype(jnp.float32)                                     # (1, E)
    bkv_f = jnp.concatenate([bk, bv], axis=1).astype(jnp.float32)     # (1, 2E)
    bo_f = bo.astype(jnp.float32)                                     # (1, E)

    tq = _choose_q_tile(S)
    n_q = S // tq

    kernel = functools.partial(
        _mhsa_kernel, num_heads=num_heads, head_dim=head_dim,
        approx_recip=(cdt != jnp.float32))

    # Advisory cost estimate: QKV + output projections, attention matmuls, exp.
    flops = 8 * B * S * E * E + 4 * B * S * S * E
    transcendentals = B * num_heads * S * S
    bytes_accessed = (2 * x.size * x.dtype.itemsize
                      + 4 * E * E * wq_c.dtype.itemsize
                      + 4 * E * 4)
    cost = pl.CostEstimate(flops=flops, transcendentals=transcendentals,
                           bytes_accessed=bytes_accessed)

    grid_spec = pltpu.PrefetchScalarGridSpec(
        num_scalar_prefetch=0,
        grid=(B, n_q),
        in_specs=[
            pl.BlockSpec((1, tq, E), lambda b, qi: (b, qi, 0)),                # x (query rows)
            pl.BlockSpec((1, S, E), lambda b, qi: (b, 0, 0)),                  # x (all rows, K/V)
            pl.BlockSpec((E, E), lambda b, qi: (0, 0)),                        # Wq
            pl.BlockSpec((E, 2 * E), lambda b, qi: (0, 0)),                    # W_kv fused
            pl.BlockSpec((num_heads, head_dim, E), lambda b, qi: (0, 0, 0)),   # Wo head-major
            pl.BlockSpec((1, E), lambda b, qi: (0, 0)),                        # bq
            pl.BlockSpec((1, 2 * E), lambda b, qi: (0, 0)),                    # b_kv
            pl.BlockSpec((1, E), lambda b, qi: (0, 0)),                        # bo
        ],
        out_specs=pl.BlockSpec((1, tq, E), lambda b, qi: (b, qi, 0)),
    )

    return pl.pallas_call(
        kernel,
        out_shape=jax.ShapeDtypeStruct((B, S, E), x.dtype),
        grid_spec=grid_spec,
        compiler_params=pltpu.CompilerParams(
            dimension_semantics=("parallel", "parallel"),
            vmem_limit_bytes=64 * 1024 * 1024),
        cost_estimate=cost,
    )(x, x, wq_c, wkv_c, wo_c, bq_f, bkv_f, bo_f)


def reference(x, params, *, num_heads):
    B, S, E = x.shape
    Dh = E // num_heads
    wq, bq, wk, bk, wv, bv, wo, bo = params
    q = x @ wq + bq[0]
    k = x @ wk + bk[0]
    v = x @ wv + bv[0]
    q = q.reshape(B, S, num_heads, Dh).transpose(0, 2, 1, 3)
    k = k.reshape(B, S, num_heads, Dh).transpose(0, 2, 1, 3)
    v = v.reshape(B, S, num_heads, Dh).transpose(0, 2, 1, 3)
    s = jnp.einsum("bhqd,bhkd->bhqk", q, k) / (Dh ** 0.5)
    p = jax.nn.softmax(s, axis=-1)
    o = jnp.einsum("bhqk,bhkd->bhqd", p, v)
    o = o.transpose(0, 2, 1, 3).reshape(B, S, E)
    return o @ wo + bo[0]


if __name__ == "__main__":
    B, S, E, H = 2, 8, 32, 4

    key = jax.random.PRNGKey(0)
    keys = jax.random.split(key, 9)
    x = jax.random.normal(keys[0], (B, S, E), dtype=jnp.float32)

    scale = 1.0 / (E ** 0.5)
    wq = jax.random.uniform(keys[1], (E, E), jnp.float32, -scale, scale)
    wk = jax.random.uniform(keys[2], (E, E), jnp.float32, -scale, scale)
    wv = jax.random.uniform(keys[3], (E, E), jnp.float32, -scale, scale)
    wo = jax.random.uniform(keys[4], (E, E), jnp.float32, -scale, scale)
    bq = jax.random.uniform(keys[5], (1, E), jnp.float32, -scale, scale)
    bk = jax.random.uniform(keys[6], (1, E), jnp.float32, -scale, scale)
    bv = jax.random.uniform(keys[7], (1, E), jnp.float32, -scale, scale)
    bo = jax.random.uniform(keys[8], (1, E), jnp.float32, -scale, scale)
    params = (wq, bq, wk, bk, wv, bv, wo, bo)

    out = multi_head_self_attention(x, params, num_heads=H)
    out = jax.block_until_ready(out)

    ref = reference(x, params, num_heads=H)
    assert out.shape == (B, S, E)
    assert jnp.allclose(out, ref, atol=2e-4, rtol=2e-4), "mismatch vs. reference"

    print("KERNEL_OK")
</pallas_src>

<mosaic_0001>
module attributes {stable_mosaic.version = 11 : i64} {
  func.func @_mhsa_kernel(%arg0: i32, %arg1: i32, %arg2: memref<1x8x32xf32, #tpu.memory_space<vmem>>, %arg3: memref<1x8x32xf32, #tpu.memory_space<vmem>>, %arg4: memref<32x32xf32, #tpu.memory_space<vmem>>, %arg5: memref<32x64xf32, #tpu.memory_space<vmem>>, %arg6: memref<4x8x32xf32, #tpu.memory_space<vmem>>, %arg7: memref<1x32xf32, #tpu.memory_space<vmem>>, %arg8: memref<1x64xf32, #tpu.memory_space<vmem>>, %arg9: memref<1x32xf32, #tpu.memory_space<vmem>>, %arg10: memref<1x8x32xf32, #tpu.memory_space<vmem>>) attributes {dimension_semantics = [#tpu.dimension_semantics<parallel>, #tpu.dimension_semantics<parallel>], iteration_bounds = array<i64: 2, 1>, scalar_prefetch = 0 : i64, scratch_operands = 0 : i64, tpu.core_type = #tpu.core_type<tc>, window_params = [{transform_indices = @transform_0, window_bounds = array<i64: 1, 8, 32>}, {transform_indices = @transform_1, window_bounds = array<i64: 1, 8, 32>}, {pipeline_mode = #tpu.pipeline_mode<synchronous>, transform_indices = @transform_2, window_bounds = array<i64: 32, 32>}, {pipeline_mode = #tpu.pipeline_mode<synchronous>, transform_indices = @transform_3, window_bounds = array<i64: 32, 64>}, {pipeline_mode = #tpu.pipeline_mode<synchronous>, transform_indices = @transform_4, window_bounds = array<i64: 4, 8, 32>}, {pipeline_mode = #tpu.pipeline_mode<synchronous>, transform_indices = @transform_5, window_bounds = array<i64: 1, 32>}, {pipeline_mode = #tpu.pipeline_mode<synchronous>, transform_indices = @transform_6, window_bounds = array<i64: 1, 64>}, {pipeline_mode = #tpu.pipeline_mode<synchronous>, transform_indices = @transform_7, window_bounds = array<i64: 1, 32>}, {transform_indices = @transform_8, window_bounds = array<i64: 1, 8, 32>}]} {
    %c0 = arith.constant 0 : index
    %c0_0 = arith.constant 0 : index
    %c0_1 = arith.constant 0 : index
    %0 = vector.load %arg2[%c0, %c0_0, %c0_1] : memref<1x8x32xf32, #tpu.memory_space<vmem>>, vector<1x8x32xf32>
    %1 = vector.shape_cast %0 : vector<1x8x32xf32> to vector<8x32xf32>
    %c0_2 = arith.constant 0 : index
    %c0_3 = arith.constant 0 : index
    %c0_4 = arith.constant 0 : index
    %2 = vector.load %arg3[%c0_2, %c0_3, %c0_4] : memref<1x8x32xf32, #tpu.memory_space<vmem>>, vector<1x8x32xf32>
    %3 = vector.shape_cast %2 : vector<1x8x32xf32> to vector<8x32xf32>
    %c0_5 = arith.constant 0 : index
    %c0_6 = arith.constant 0 : index
    %4 = vector.load %arg4[%c0_5, %c0_6] : memref<32x32xf32, #tpu.memory_space<vmem>>, vector<32x32xf32>
    %cst = arith.constant dense<0.000000e+00> : vector<8x32xf32>
    %5 = tpu.matmul %1, %4, %cst {dimension_numbers = #tpu.dot_dimension_numbers<[1], [0], [0], [1], [0, 0, 1, 1], [], []>} : vector<8x32xf32>, vector<32x32xf32>, vector<8x32xf32> -> vector<8x32xf32>
    %c0_7 = arith.constant 0 : index
    %c0_8 = arith.constant 0 : index
    %6 = vector.load %arg7[%c0_7, %c0_8] : memref<1x32xf32, #tpu.memory_space<vmem>>, vector<1x32xf32>
    %7 = vector.broadcast %6 : vector<1x32xf32> to vector<8x32xf32>
    %8 = arith.addf %5, %7 : vector<8x32xf32>
    %c0_9 = arith.constant 0 : index
    %c0_10 = arith.constant 0 : index
    %9 = vector.load %arg5[%c0_9, %c0_10] : memref<32x64xf32, #tpu.memory_space<vmem>>, vector<32x64xf32>
    %cst_11 = arith.constant dense<0.000000e+00> : vector<8x64xf32>
    %10 = tpu.matmul %3, %9, %cst_11 {dimension_numbers = #tpu.dot_dimension_numbers<[1], [0], [0], [1], [0, 0, 1, 1], [], []>} : vector<8x32xf32>, vector<32x64xf32>, vector<8x64xf32> -> vector<8x64xf32>
    %c0_12 = arith.constant 0 : index
    %c0_13 = arith.constant 0 : index
    %11 = vector.load %arg8[%c0_12, %c0_13] : memref<1x64xf32, #tpu.memory_space<vmem>>, vector<1x64xf32>
    %12 = vector.broadcast %11 : vector<1x64xf32> to vector<8x64xf32>
    %13 = arith.addf %10, %12 : vector<8x64xf32>
    %14 = vector.extract_strided_slice %13 {offsets = [0, 0], sizes = [8, 32], strides = [1, 1]} : vector<8x64xf32> to vector<8x32xf32>
    %15 = vector.extract_strided_slice %13 {offsets = [0, 32], sizes = [8, 32], strides = [1, 1]} : vector<8x64xf32> to vector<8x32xf32>
    %16 = vector.extract_strided_slice %8 {offsets = [0, 0], sizes = [8, 8], strides = [1, 1]} : vector<8x32xf32> to vector<8x8xf32>
    %17 = vector.extract_strided_slice %14 {offsets = [0, 0], sizes = [8, 8], strides = [1, 1]} : vector<8x32xf32> to vector<8x8xf32>
    %18 = vector.extract_strided_slice %15 {offsets = [0, 0], sizes = [8, 8], strides = [1, 1]} : vector<8x32xf32> to vector<8x8xf32>
    %cst_14 = arith.constant dense<0.000000e+00> : vector<8x8xf32>
    %19 = tpu.matmul %16, %17, %cst_14 {dimension_numbers = #tpu.dot_dimension_numbers<[1], [1], [0], [0], [0, 0, 1, 0], [], []>} : vector<8x8xf32>, vector<8x8xf32>, vector<8x8xf32> -> vector<8x8xf32>
    %cst_15 = arith.constant 0.353553385 : f32
    %20 = vector.broadcast %cst_15 : f32 to vector<8x8xf32>
    %21 = arith.mulf %19, %20 : vector<8x8xf32>
    %cst_16 = arith.constant dense<0xFF800000> : vector<8xf32>
    %22 = vector.multi_reduction <maximumf>, %21, %cst_16 [1] : vector<8x8xf32> to vector<8xf32>
    %23 = vector.shape_cast %22 : vector<8xf32> to vector<8x1xf32>
    %24 = vector.broadcast %23 : vector<8x1xf32> to vector<8x8xf32>
    %25 = arith.subf %21, %24 : vector<8x8xf32>
    %26 = math.exp %25 : vector<8x8xf32>
    %cst_17 = arith.constant dense<0.000000e+00> : vector<8xf32>
    %27 = vector.multi_reduction <add>, %26, %cst_17 [1] : vector<8x8xf32> to vector<8xf32>
    %28 = vector.shape_cast %27 : vector<8xf32> to vector<8x1xf32>
    %cst_18 = arith.constant dense<0.000000e+00> : vector<8x8xf32>
    %29 = tpu.matmul %26, %18, %cst_18 {dimension_numbers = #tpu.dot_dimension_numbers<[1], [0], [0], [1], [0, 0, 1, 1], [], []>} : vector<8x8xf32>, vector<8x8xf32>, vector<8x8xf32> -> vector<8x8xf32>
    %30 = tpu.reciprocal %28 : vector<8x1xf32> -> vector<8x1xf32>
    %31 = vector.broadcast %30 : vector<8x1xf32> to vector<8x8xf32>
    %32 = arith.mulf %29, %31 : vector<8x8xf32>
    %c0_19 = arith.constant 0 : index
    %c0_20 = arith.constant 0 : index
    %c0_21 = arith.constant 0 : index
    %33 = vector.load %arg6[%c0_19, %c0_20, %c0_21] : memref<4x8x32xf32, #tpu.memory_space<vmem>>, vector<1x8x32xf32>
    %34 = vector.shape_cast %33 : vector<1x8x32xf32> to vector<8x32xf32>
    %cst_22 = arith.constant dense<0.000000e+00> : vector<8x32xf32>
    %35 = tpu.matmul %32, %34, %cst_22 {dimension_numbers = #tpu.dot_dimension_numbers<[1], [0], [0], [1], [0, 0, 1, 1], [], []>} : vector<8x8xf32>, vector<8x32xf32>, vector<8x32xf32> -> vector<8x32xf32>
    %36 = vector.extract_strided_slice %8 {offsets = [0, 8], sizes = [8, 8], strides = [1, 1]} : vector<8x32xf32> to vector<8x8xf32>
    %37 = vector.extract_strided_slice %14 {offsets = [0, 8], sizes = [8, 8], strides = [1, 1]} : vector<8x32xf32> to vector<8x8xf32>
    %38 = vector.extract_strided_slice %15 {offsets = [0, 8], sizes = [8, 8], strides = [1, 1]} : vector<8x32xf32> to vector<8x8xf32>
    %cst_23 = arith.constant dense<0.000000e+00> : vector<8x8xf32>
    %39 = tpu.matmul %36, %37, %cst_23 {dimension_numbers = #tpu.dot_dimension_numbers<[1], [1], [0], [0], [0, 0, 1, 0], [], []>} : vector<8x8xf32>, vector<8x8xf32>, vector<8x8xf32> -> vector<8x8xf32>
    %cst_24 = arith.constant 0.353553385 : f32
    %40 = vector.broadcast %cst_24 : f32 to vector<8x8xf32>
    %41 = arith.mulf %39, %40 : vector<8x8xf32>
    %cst_25 = arith.constant dense<0xFF800000> : vector<8xf32>
    %42 = vector.multi_reduction <maximumf>, %41, %cst_25 [1] : vector<8x8xf32> to vector<8xf32>
    %43 = vector.shape_cast %42 : vector<8xf32> to vector<8x1xf32>
    %44 = vector.broadcast %43 : vector<8x1xf32> to vector<8x8xf32>
    %45 = arith.subf %41, %44 : vector<8x8xf32>
    %46 = math.exp %45 : vector<8x8xf32>
    %cst_26 = arith.constant dense<0.000000e+00> : vector<8xf32>
    %47 = vector.multi_reduction <add>, %46, %cst_26 [1] : vector<8x8xf32> to vector<8xf32>
    %48 = vector.shape_cast %47 : vector<8xf32> to vector<8x1xf32>
    %cst_27 = arith.constant dense<0.000000e+00> : vector<8x8xf32>
    %49 = tpu.matmul %46, %38, %cst_27 {dimension_numbers = #tpu.dot_dimension_numbers<[1], [0], [0], [1], [0, 0, 1, 1], [], []>} : vector<8x8xf32>, vector<8x8xf32>, vector<8x8xf32> -> vector<8x8xf32>
    %50 = tpu.reciprocal %48 : vector<8x1xf32> -> vector<8x1xf32>
    %51 = vector.broadcast %50 : vector<8x1xf32> to vector<8x8xf32>
    %52 = arith.mulf %49, %51 : vector<8x8xf32>
    %c1 = arith.constant 1 : index
    %c0_28 = arith.constant 0 : index
    %c0_29 = arith.constant 0 : index
    %53 = vector.load %arg6[%c1, %c0_28, %c0_29] : memref<4x8x32xf32, #tpu.memory_space<vmem>>, vector<1x8x32xf32>
    %54 = vector.shape_cast %53 : vector<1x8x32xf32> to vector<8x32xf32>
    %cst_30 = arith.constant dense<0.000000e+00> : vector<8x32xf32>
    %55 = tpu.matmul %52, %54, %cst_30 {dimension_numbers = #tpu.dot_dimension_numbers<[1], [0], [0], [1], [0, 0, 1, 1], [], []>} : vector<8x8xf32>, vector<8x32xf32>, vector<8x32xf32> -> vector<8x32xf32>
    %56 = arith.addf %35, %55 : vector<8x32xf32>
    %57 = vector.extract_strided_slice %8 {offsets = [0, 16], sizes = [8, 8], strides = [1, 1]} : vector<8x32xf32> to vector<8x8xf32>
    %58 = vector.extract_strided_slice %14 {offsets = [0, 16], sizes = [8, 8], strides = [1, 1]} : vector<8x32xf32> to vector<8x8xf32>
    %59 = vector.extract_strided_slice %15 {offsets = [0, 16], sizes = [8, 8], strides = [1, 1]} : vector<8x32xf32> to vector<8x8xf32>
    %cst_31 = arith.constant dense<0.000000e+00> : vector<8x8xf32>
    %60 = tpu.matmul %57, %58, %cst_31 {dimension_numbers = #tpu.dot_dimension_numbers<[1], [1], [0], [0], [0, 0, 1, 0], [], []>} : vector<8x8xf32>, vector<8x8xf32>, vector<8x8xf32> -> vector<8x8xf32>
    %cst_32 = arith.constant 0.353553385 : f32
    %61 = vector.broadcast %cst_32 : f32 to vector<8x8xf32>
    %62 = arith.mulf %60, %61 : vector<8x8xf32>
    %cst_33 = arith.constant dense<0xFF800000> : vector<8xf32>
    %63 = vector.multi_reduction <maximumf>, %62, %cst_33 [1] : vector<8x8xf32> to vector<8xf32>
    %64 = vector.shape_cast %63 : vector<8xf32> to vector<8x1xf32>
    %65 = vector.broadcast %64 : vector<8x1xf32> to vector<8x8xf32>
    %66 = arith.subf %62, %65 : vector<8x8xf32>
    %67 = math.exp %66 : vector<8x8xf32>
    %cst_34 = arith.constant dense<0.000000e+00> : vector<8xf32>
    %68 = vector.multi_reduction <add>, %67, %cst_34 [1] : vector<8x8xf32> to vector<8xf32>
    %69 = vector.shape_cast %68 : vector<8xf32> to vector<8x1xf32>
    %cst_35 = arith.constant dense<0.000000e+00> : vector<8x8xf32>
    %70 = tpu.matmul %67, %59, %cst_35 {dimension_numbers = #tpu.dot_dimension_numbers<[1], [0], [0], [1], [0, 0, 1, 1], [], []>} : vector<8x8xf32>, vector<8x8xf32>, vector<8x8xf32> -> vector<8x8xf32>
    %71 = tpu.reciprocal %69 : vector<8x1xf32> -> vector<8x1xf32>
    %72 = vector.broadcast %71 : vector<8x1xf32> to vector<8x8xf32>
    %73 = arith.mulf %70, %72 : vector<8x8xf32>
    %c2 = arith.constant 2 : index
    %c0_36 = arith.constant 0 : index
    %c0_37 = arith.constant 0 : index
    %74 = vector.load %arg6[%c2, %c0_36, %c0_37] : memref<4x8x32xf32, #tpu.memory_space<vmem>>, vector<1x8x32xf32>
    %75 = vector.shape_cast %74 : vector<1x8x32xf32> to vector<8x32xf32>
    %cst_38 = arith.constant dense<0.000000e+00> : vector<8x32xf32>
    %76 = tpu.matmul %73, %75, %cst_38 {dimension_numbers = #tpu.dot_dimension_numbers<[1], [0], [0], [1], [0, 0, 1, 1], [], []>} : vector<8x8xf32>, vector<8x32xf32>, vector<8x32xf32> -> vector<8x32xf32>
    %77 = arith.addf %56, %76 : vector<8x32xf32>
    %78 = vector.extract_strided_slice %8 {offsets = [0, 24], sizes = [8, 8], strides = [1, 1]} : vector<8x32xf32> to vector<8x8xf32>
    %79 = vector.extract_strided_slice %14 {offsets = [0, 24], sizes = [8, 8], strides = [1, 1]} : vector<8x32xf32> to vector<8x8xf32>
    %80 = vector.extract_strided_slice %15 {offsets = [0, 24], sizes = [8, 8], strides = [1, 1]} : vector<8x32xf32> to vector<8x8xf32>
    %cst_39 = arith.constant dense<0.000000e+00> : vector<8x8xf32>
    %81 = tpu.matmul %78, %79, %cst_39 {dimension_numbers = #tpu.dot_dimension_numbers<[1], [1], [0], [0], [0, 0, 1, 0], [], []>} : vector<8x8xf32>, vector<8x8xf32>, vector<8x8xf32> -> vector<8x8xf32>
    %cst_40 = arith.constant 0.353553385 : f32
    %82 = vector.broadcast %cst_40 : f32 to vector<8x8xf32>
    %83 = arith.mulf %81, %82 : vector<8x8xf32>
    %cst_41 = arith.constant dense<0xFF800000> : vector<8xf32>
    %84 = vector.multi_reduction <maximumf>, %83, %cst_41 [1] : vector<8x8xf32> to vector<8xf32>
    %85 = vector.shape_cast %84 : vector<8xf32> to vector<8x1xf32>
    %86 = vector.broadcast %85 : vector<8x1xf32> to vector<8x8xf32>
    %87 = arith.subf %83, %86 : vector<8x8xf32>
    %88 = math.exp %87 : vector<8x8xf32>
    %cst_42 = arith.constant dense<0.000000e+00> : vector<8xf32>
    %89 = vector.multi_reduction <add>, %88, %cst_42 [1] : vector<8x8xf32> to vector<8xf32>
    %90 = vector.shape_cast %89 : vector<8xf32> to vector<8x1xf32>
    %cst_43 = arith.constant dense<0.000000e+00> : vector<8x8xf32>
    %91 = tpu.matmul %88, %80, %cst_43 {dimension_numbers = #tpu.dot_dimension_numbers<[1], [0], [0], [1], [0, 0, 1, 1], [], []>} : vector<8x8xf32>, vector<8x8xf32>, vector<8x8xf32> -> vector<8x8xf32>
    %92 = tpu.reciprocal %90 : vector<8x1xf32> -> vector<8x1xf32>
    %93 = vector.broadcast %92 : vector<8x1xf32> to vector<8x8xf32>
    %94 = arith.mulf %91, %93 : vector<8x8xf32>
    %c3 = arith.constant 3 : index
    %c0_44 = arith.constant 0 : index
    %c0_45 = arith.constant 0 : index
    %95 = vector.load %arg6[%c3, %c0_44, %c0_45] : memref<4x8x32xf32, #tpu.memory_space<vmem>>, vector<1x8x32xf32>
    %96 = vector.shape_cast %95 : vector<1x8x32xf32> to vector<8x32xf32>
    %cst_46 = arith.constant dense<0.000000e+00> : vector<8x32xf32>
    %97 = tpu.matmul %94, %96, %cst_46 {dimension_numbers = #tpu.dot_dimension_numbers<[1], [0], [0], [1], [0, 0, 1, 1], [], []>} : vector<8x8xf32>, vector<8x32xf32>, vector<8x32xf32> -> vector<8x32xf32>
    %98 = arith.addf %77, %97 : vector<8x32xf32>
    %c0_47 = arith.constant 0 : index
    %c0_48 = arith.constant 0 : index
    %99 = vector.load %arg9[%c0_47, %c0_48] : memref<1x32xf32, #tpu.memory_space<vmem>>, vector<1x32xf32>
    %100 = vector.broadcast %99 : vector<1x32xf32> to vector<8x32xf32>
    %101 = arith.addf %98, %100 : vector<8x32xf32>
    %c0_49 = arith.constant 0 : index
    %c0_50 = arith.constant 0 : index
    %c0_51 = arith.constant 0 : index
    %102 = vector.load %arg10[%c0_49, %c0_50, %c0_51] : memref<1x8x32xf32, #tpu.memory_space<vmem>>, vector<1x8x32xf32>
    %103 = vector.shape_cast %102 : vector<1x8x32xf32> to vector<8x32xf32>
    %104 = vector.shape_cast %101 : vector<8x32xf32> to vector<1x8x32xf32>
    tpu.vector_store %arg10[%c0_49, %c0_50, %c0_51], %104 {strides = array<i32>} : memref<1x8x32xf32, #tpu.memory_space<vmem>>, vector<1x8x32xf32>,
    return
  }
  func.func @transform_0(%arg0: i32, %arg1: i32) -> (i32, i32, i32) {
    %c0_i32 = arith.constant 0 : i32
    %c0_i32_0 = arith.constant 0 : i32
    return %arg0, %arg1, %c0_i32 : i32, i32, i32
  }
  func.func @transform_1(%arg0: i32, %arg1: i32) -> (i32, i32, i32) {
    %c0_i32 = arith.constant 0 : i32
    %c0_i32_0 = arith.constant 0 : i32
    %c0_i32_1 = arith.constant 0 : i32
    return %arg0, %c0_i32, %c0_i32_0 : i32, i32, i32
  }
  func.func @transform_2(%arg0: i32, %arg1: i32) -> (i32, i32) {
    %c0_i32 = arith.constant 0 : i32
    %c0_i32_0 = arith.constant 0 : i32
    %c0_i32_1 = arith.constant 0 : i32
    return %c0_i32, %c0_i32_0 : i32, i32
  }
  func.func @transform_3(%arg0: i32, %arg1: i32) -> (i32, i32) {
    %c0_i32 = arith.constant 0 : i32
    %c0_i32_0 = arith.constant 0 : i32
    %c0_i32_1 = arith.constant 0 : i32
    return %c0_i32, %c0_i32_0 : i32, i32
  }
  func.func @transform_4(%arg0: i32, %arg1: i32) -> (i32, i32, i32) {
    %c0_i32 = arith.constant 0 : i32
    %c0_i32_0 = arith.constant 0 : i32
    %c0_i32_1 = arith.constant 0 : i32
    %c0_i32_2 = arith.constant 0 : i32
    return %c0_i32, %c0_i32_0, %c0_i32_1 : i32, i32, i32
  }
  func.func @transform_5(%arg0: i32, %arg1: i32) -> (i32, i32) {
    %c0_i32 = arith.constant 0 : i32
    %c0_i32_0 = arith.constant 0 : i32
    %c0_i32_1 = arith.constant 0 : i32
    return %c0_i32, %c0_i32_0 : i32, i32
  }
  func.func @transform_6(%arg0: i32, %arg1: i32) -> (i32, i32) {
    %c0_i32 = arith.constant 0 : i32
    %c0_i32_0 = arith.constant 0 : i32
    %c0_i32_1 = arith.constant 0 : i32
    return %c0_i32, %c0_i32_0 : i32, i32
  }
  func.func @transform_7(%arg0: i32, %arg1: i32) -> (i32, i32) {
    %c0_i32 = arith.constant 0 : i32
    %c0_i32_0 = arith.constant 0 : i32
    %c0_i32_1 = arith.constant 0 : i32
    return %c0_i32, %c0_i32_0 : i32, i32
  }
  func.func @transform_8(%arg0: i32, %arg1: i32) -> (i32, i32, i32) {
    %c0_i32 = arith.constant 0 : i32
    %c0_i32_0 = arith.constant 0 : i32
    return %arg0, %arg1, %c0_i32 : i32, i32, i32
  }
}

</mosaic_0001>

<bundles_post_ra>
// kernel: tpu_custom_call.1
= control target key start
LH: loop header
LB: loop body
LE: loop exit
PB: predicated region body
PF: predicated region fallthrough
CT: control target
= control target key end

     0   :  { %s2972_s0 = inlined_call_operand.hbm [shape: f32[2,8,32], index: 0, kind: input, shape index: {}]   ;;  %s2973_s1 = inlined_call_operand.hbm [shape: f32[2,8,32], index: 1, kind: input, shape index: {}]   ;;  %s2974_s2 = inlined_call_operand.hbm [shape: f32[32,32], index: 2, kind: input, shape index: {}]   ;;  %s2975_s3 = inlined_call_operand.hbm [shape: f32[32,64], index: 3, kind: input, shape index: {}]   ;;  %s2976_s4 = inlined_call_operand.hbm [shape: f32[4,8,32], index: 4, kind: input, shape index: {}]   ;;  %s2977_s5 = inlined_call_operand.hbm [shape: f32[1,32], index: 5, kind: input, shape index: {}]   ;;  %s2978_s6 = inlined_call_operand.hbm [shape: f32[1,64], index: 6, kind: input, shape index: {}]   ;;  %s2979_s7 = inlined_call_operand.hbm [shape: f32[1,32], index: 7, kind: input, shape index: {}]   ;;  %s2980_s8 = inlined_call_operand.hbm [shape: f32[2,8,32], index: 8, kind: output, shape index: {}]  }
   0x1   :  { %2987 = sst [smem:[#allocation25_spill]] %s2974_s2 }
   0x2   :  { %2988 = sst [smem:[#allocation26_spill]] %s2975_s3 }
   0x3   :  { %2989 = sst [smem:[#allocation27_spill]] %s2976_s4 }
   0x4   :  { %2990 = sst [smem:[#allocation28_spill]] %s2977_s5 }
   0x5   :  { %2991 = sst [smem:[#allocation29_spill]] %s2978_s6 }
   0x6   :  { %2992 = sst [smem:[#allocation30_spill]] %s2980_s8 }
   0x7   :  { %13 = vsyncpa [#allocation3], 0 }
   0x8   :  { %15 = vsyncpa [#allocation3 + $0x1], 0 }
   0x9   :  { %16 = vsyncpa [#allocation6], 0 }
   0xa   :  { %18 = vsyncpa [#allocation6 + $0x1], 0 }
   0xb   :  { %19 = vsyncpa [#allocation9], 0 }
   0xc   :  { %20 = vsyncpa [#allocation12], 0 }
   0xd   :  { %21 = vsyncpa [#allocation15], 0 }
   0xe   :  { %22 = vsyncpa [#allocation4], 0 }
   0xf   :  { %24 = vsyncpa [#allocation4 + $0x1], 0  ;;  %s2506_s27 = smov 0   ;;  %s2508_s28 = smov 0  }
  0x10   :  { %s2510_s29 = smov 0   ;;  %s2512_s30 = smov 0  }
  0x11   :  { %s2514_s9 = smov 0   ;;  %s2516_s10 = smov 0  }
  0x12 LB: > { %2993 = sst [smem:[#allocation24_spill]] %s2430_s30  ;;  %s2537_s11 = sadd.s32 4294967295, %s2438_s10   ;;  %s2438_s10 = sphi %s2516_s10, %s30_s10   ;;  %s2434_s9 = sphi %s2514_s9, %s3029_s9   ;;  %s2430_s30 = sphi %s2512_s30, %s3028_s30   ;;  %s2426_s29 = sphi %s2510_s29, %s3027_s29   ;;  %s2422_s28 = sphi %s2508_s28, %s3026_s28   ;;  %s2418_s27 = sphi %s2506_s27, %s3025_s27  }
  0x13   : > { %p1777_p0 = scmp.ge.s32.totalorder %s2438_s10, 1  ;;  %p2982_p1 = scmp.eq.s32.totalorder %s2537_s11, 0 }
  0x14   : > { %p255_p2 = scmp.lt.s32.totalorder %s2438_s10, 3  ;;  %s2440_s13 = smov [#allocation7]  }
  0x15   : > { %s267_s14 = sshll.u32 %s2440_s13, 4  ;;  %s2441_s16 = smov [#allocation8]   ;;  %s2546_s14 = int_to_ptr.vmem [resolvable:$true] %s267_s14 }
  0x16   : > { %p2542_p3 = pnand %p1777_p0, %p255_p2  ;;  %s280_s17 = sshll.u32 %s2441_s16, 4  ;;  %s2557_s17 = int_to_ptr.vmem [resolvable:$true] %s280_s17 }
  0x17   : > { %s2442_s18 = smov [#allocation11]   ;;  %s2996_s2 = sld [smem:[#allocation25_spill]] }
  0x18   : > { %s2994_s12 = scalar_select %p2542_p3, 1, 0 }
  0x19   : > { %p1982_p4 = pneg %p2542_p3  ;;  %s2559_s19 = sshll.u32 %s2442_s18, 4  ;;  %s308_s19 = int_to_ptr.vmem [resolvable:$true] %s2559_s19 }
  0x1b   : > { %p2553_p6 = pnand %p1982_p4, %p2982_p1 }
  0x1d   : > { %s2108_s22 = scalar_lea.hbm %s2996_s2, 512  ;;  %p2569_p8 = pneg %p2553_p6 }
  0x1e   : > { %p2109_p7 = scmp.ne.s32.totalorder %s2996_s2, %s2108_s22  ;;  %p2115_p11 = scmp.lt.u32.totalorder %s2108_s22, %s2996_s2 }
  0x20   : > { %p2111_p9 = pnand %p2569_p8, %p2109_p7 }
  0x22   : > { %p2112_p10 = pneg %p2111_p9 }
  0x24   : > { %p2117_p12 = pnand %p2115_p11, %p2112_p10 }
  0x26   : > { %2120 = shalt.err (!%p2117_p12)
}
  0x27   : > { %s2121_s16 = scalar_lea.vmem %s2546_s14, 512  ;;  %p2129_p4 = scmp.lt.s32.totalorder %s2546_s14, %s2546_s14 }
  0x28   : > { %p2122_p13 = scmp.ne.s32.totalorder %s2546_s14, %s2121_s16  ;;  %p2130_p5 = scmp.lt.s32.totalorder %s2121_s16, %s2121_s16 }
  0x2a   : > { %p2124_p0 = pnand %p2122_p13, %p2569_p8  ;;  %p2131_p7 = por %p2130_p5, %p2129_p4 }
  0x2c   : > { %p2125_p2 = pneg %p2124_p0 }
  0x2e   : > { %p2132_p9 = pnand %p2131_p7, %p2125_p2 }
  0x30   : > { %2135 = shalt.err (!%p2132_p9)
}
  0x31   : > { %s2984_s18 = smov 128   ;;  %s2444_s20 = smov 8  }
  0x32   : > { %1985 = dma.hbm_to_vmem [thread:$0]  (!%p2553_p6), %s2996_s2, 512, %s2546_s14, [#allocation6], %s2984_s18, %s2984_s18, %s2444_s20  }
  0x33   : > { %s2998_s3 = sld [smem:[#allocation26_spill]] }
  0x39   : > { %s2136_s26 = scalar_lea.hbm %s2998_s3, 512 }
  0x3a   : > { %p2137_p5 = scmp.ne.s32.totalorder %s2998_s3, %s2136_s26  ;;  %p2143_p12 = scmp.lt.u32.totalorder %s2136_s26, %s2998_s3 }
  0x3c   : > { %p2139_p10 = pnand %p2137_p5, %p2569_p8 }
  0x3e   : > { %p2140_p11 = pneg %p2139_p10 }
  0x40   : > { %p2145_p13 = pnand %p2143_p12, %p2140_p11 }
  0x42   : > { %2148 = shalt.err (!%p2145_p13)
}
  0x43   : > { %s2149_s14 = scalar_lea.vmem %s2557_s17, 512  ;;  %p2157_p7 = scmp.lt.s32.totalorder %s2557_s17, %s2557_s17 }
  0x44   : > { %p2150_p0 = scmp.ne.s32.totalorder %s2557_s17, %s2149_s14  ;;  %p2158_p9 = scmp.lt.s32.totalorder %s2149_s14, %s2149_s14 }
  0x46   : > { %p2152_p2 = pnand %p2150_p0, %p2569_p8  ;;  %p2159_p5 = por %p2158_p9, %p2157_p7 }
  0x48   : > { %p2153_p4 = pneg %p2152_p2 }
  0x4a   : > { %p2160_p10 = pnand %p2159_p5, %p2153_p4 }
  0x4c   : > { %2163 = shalt.err (!%p2160_p10)
}
  0x4d   : > { %1988 = dma.hbm_to_vmem [thread:$0]  (!%p2553_p6), %s2998_s3, 512, %s2557_s17, [#allocation9], %s2984_s18, %s2984_s18, %s2444_s20  }
  0x4e   : > { %s2999_s5 = sld [smem:[#allocation28_spill]] }
  0x54   : > { %s2164_s23 = scalar_lea.hbm %s2999_s5, 16 }
  0x55   : > { %p2165_p11 = scmp.ne.s32.totalorder %s2999_s5, %s2164_s23  ;;  %p2171_p0 = scmp.lt.u32.totalorder %s2164_s23, %s2999_s5 }
  0x57   : > { %p2167_p12 = pnand %p2165_p11, %p2569_p8 }
  0x59   : > { %p2168_p13 = pneg %p2167_p12 }
  0x5b   : > { %p2173_p2 = pnand %p2171_p0, %p2168_p13 }
  0x5d   : > { %2176 = shalt.err (!%p2173_p2)
}
  0x5e   : > { %s2177_s14 = scalar_lea.vmem %s308_s19, 16  ;;  %s2184_s17 = scalar_lea.vmem %s308_s19, 32 }
  0x5f   : > { %p2178_p4 = scmp.ne.s32.totalorder %s308_s19, %s2177_s14  ;;  %p2185_p5 = scmp.lt.s32.totalorder %s308_s19, %s308_s19 }
  0x60   : > { %p2186_p10 = scmp.lt.s32.totalorder %s2184_s17, %s2177_s14 }
  0x61   : > { %p2180_p7 = pnand %p2178_p4, %p2569_p8 }
  0x62   : > { %p2187_p1 = por %p2186_p10, %p2185_p5 }
  0x63   : > { %p2181_p9 = pneg %p2180_p7 }
  0x65   : > { %p2188_p3 = pnand %p2187_p1, %p2181_p9 }
  0x67   : > { %2191 = shalt.err (!%p2188_p3)
}
  0x68   : > { %1994 = dma.hbm_to_vmem [thread:$0]  (!%p2553_p6), %s2999_s5, 16, %s308_s19, [#allocation12]  }
  0x69   : > { %s2445_s21 = smov [#allocation10]   ;;  %s2446_s23 = smov [#allocation13]  }
  0x6a   : > { %s293_s22 = sshll.u32 %s2445_s21, 4  ;;  %s318_s24 = sshll.u32 %s2446_s23, 4  ;;  %s294_s22 = int_to_ptr.vmem [resolvable:$true] %s293_s22  ;;  %s319_s24 = int_to_ptr.vmem [resolvable:$true] %s318_s24 }
  0x6b   : > { %s3000_s4 = sld [smem:[#allocation27_spill]] }
  0x71   : > { %s2192_s16 = scalar_lea.hbm %s3000_s4, 512 }
  0x72   : > { %p2193_p1 = scmp.ne.s32.totalorder %s3000_s4, %s2192_s16  ;;  %p2199_p12 = scmp.lt.u32.totalorder %s2192_s16, %s3000_s4 }
  0x74   : > { %p2195_p3 = pnand %p2193_p1, %p2569_p8 }
  0x76   : > { %p2196_p11 = pneg %p2195_p3 }
  0x78   : > { %p2201_p13 = pnand %p2199_p12, %p2196_p11 }
  0x7a   : > { %2204 = shalt.err (!%p2201_p13)
}
  0x7b   : > { %s2205_s19 = scalar_lea.vmem %s294_s22, 512  ;;  %p2213_p7 = scmp.lt.s32.totalorder %s294_s22, %s294_s22 }
  0x7c   : > { %p2206_p0 = scmp.ne.s32.totalorder %s294_s22, %s2205_s19  ;;  %p2214_p9 = scmp.lt.s32.totalorder %s2205_s19, %s2205_s19 }
  0x7e   : > { %p2208_p2 = pnand %p2206_p0, %p2569_p8  ;;  %p2215_p5 = por %p2214_p9, %p2213_p7 }
  0x80   : > { %p2209_p4 = pneg %p2208_p2 }
  0x82   : > { %p2216_p10 = pnand %p2215_p5, %p2209_p4 }
  0x84   : > { %2219 = shalt.err (!%p2216_p10)
}
  0x85   : > { %s3001_s30 = smov 128   ;;  %s3002_s6 = sld [smem:[#allocation29_spill]] }
  0x86   : > { %1991 = dma.hbm_to_vmem [thread:$0]  (!%p2553_p6), %s3000_s4, 512, %s294_s22, [#allocation9], %s3001_s30, %s3001_s30, %s2444_s20  }
  0x8b   : > { %s2220_s13 = scalar_lea.hbm %s3002_s6, 16 }
  0x8c   : > { %p2221_p1 = scmp.ne.s32.totalorder %s3002_s6, %s2220_s13  ;;  %p2227_p12 = scmp.lt.u32.totalorder %s2220_s13, %s3002_s6 }
  0x8e   : > { %p2223_p3 = pnand %p2221_p1, %p2569_p8 }
  0x90   : > { %p2224_p11 = pneg %p2223_p3 }
  0x92   : > { %p2229_p13 = pnand %p2227_p12, %p2224_p11 }
  0x94   : > { %2232 = shalt.err (!%p2229_p13)
}
  0x95   : > { %s2233_s19 = scalar_lea.vmem %s319_s24, 16  ;;  %s2240_s20 = scalar_lea.vmem %s319_s24, 32 }
  0x96   : > { %p2234_p0 = scmp.ne.s32.totalorder %s319_s24, %s2233_s19  ;;  %p2241_p7 = scmp.lt.s32.totalorder %s319_s24, %s319_s24 }
  0x97   : > { %p2242_p9 = scmp.lt.s32.totalorder %s2240_s20, %s2233_s19 }
  0x98   : > { %p2236_p2 = pnand %p2234_p0, %p2569_p8 }
  0x99   : > { %p2243_p5 = por %p2242_p9, %p2241_p7 }
  0x9a   : > { %p2237_p4 = pneg %p2236_p2 }
  0x9c   : > { %p2244_p10 = pnand %p2243_p5, %p2237_p4 }
  0x9e   : > { %2247 = shalt.err (!%p2244_p10)
}
  0x9f   : > { %1997 = dma.hbm_to_vmem [thread:$0]  (!%p2553_p6), %s3002_s6, 16, %s319_s24, [#allocation12]  }
  0xa0   : > { %s2447_s18 = smov [#allocation14]   ;;  %s2248_s13 = scalar_lea.hbm %s2979_s7, 16 }
  0xa1   : > { %s329_s21 = sshll.u32 %s2447_s18, 4  ;;  %p2249_p1 = scmp.ne.s32.totalorder %s2979_s7, %s2248_s13  ;;  %s330_s21 = int_to_ptr.vmem [resolvable:$true] %s329_s21 }
  0xa2   : > { %p2255_p12 = scmp.lt.u32.totalorder %s2248_s13, %s2979_s7 }
  0xa3   : > { %p2251_p3 = pnand %p2249_p1, %p2569_p8 }
  0xa5   : > { %p2252_p11 = pneg %p2251_p3 }
  0xa7   : > { %p2257_p13 = pnand %p2255_p12, %p2252_p11 }
  0xa9   : > { %2260 = shalt.err (!%p2257_p13)
}
  0xaa   : > { %s2261_s24 = scalar_lea.vmem %s330_s21, 16  ;;  %s2268_s19 = scalar_lea.vmem %s330_s21, 32 }
  0xab   : > { %p2262_p0 = scmp.ne.s32.totalorder %s330_s21, %s2261_s24  ;;  %p2269_p7 = scmp.lt.s32.totalorder %s330_s21, %s330_s21 }
  0xac   : > { %p2270_p9 = scmp.lt.s32.totalorder %s2268_s19, %s2261_s24 }
  0xad   : > { %p2264_p2 = pnand %p2262_p0, %p2569_p8 }
  0xae   : > { %p2271_p5 = por %p2270_p9, %p2269_p7 }
  0xaf   : > { %p2265_p4 = pneg %p2264_p2 }
  0xb1   : > { %p2272_p10 = pnand %p2271_p5, %p2265_p4 }
  0xb3   : > { %2275 = shalt.err (!%p2272_p10)
}
  0xb4   : > { %2000 = dma.hbm_to_vmem [thread:$0]  (!%p2553_p6), %s2979_s7, 16, %s330_s21, [#allocation15]  }
  0xb5   : > { %s1776_s25 = sadd.s32 4294967294, %s2438_s10   ;;  %s42_s30 = sadd.s32 1, %s2434_s9 }
  0xb6   : > { %p44_p8 = scmp.ge.s32.totalorder %s42_s30, 2  ;;  %s51_s15 = sadd.s32 1, %s2426_s29 }
  0xb7   : > { %p58_p1 = scmp.ne.s32.totalorder %s2426_s29, %s2422_s28  ;;  %p59_p3 = scmp.eq.s32.totalorder %s2438_s10, 0 }
  0xb8   : > { %s3031_s30 = smov (%p44_p8, %s42_s30), 0  ;;  %p64_p12 = scmp.ne.s32.totalorder %s2422_s28, %s2418_s27 }
  0xb9   : > { %p2703_p11 = por %p59_p3, %p58_p1  ;;  %s46_s21 = ssub.s32 %s2434_s9, %s3031_s30 }
  0xba   : > { %p242_p6 = scmp.eq.s32.totalorder %s2537_s11, 1  ;;  %p49_p13 = scmp.eq.s32.totalorder %s46_s21, 0 }
  0xbb   : > { %p3004_p0 = scmp.eq.s32.totalorder %s2537_s11, 0  ;;  %p248_p7 = scmp.eq.s32.totalorder %s1776_s25, 1 }
  0xbc   : > { %p2718_p4 = por %p242_p6, %p58_p1  ;;  %p2018_p5 = scmp.lt.s32.totalorder %s2438_s10, 2 }
  0xbd   : > { %p2714_p2 = por %p3004_p0, %p64_p12  ;;  %p2725_p9 = por %p248_p7, %p64_p12 }
  0xbe   : > { %s3006_s26 = scalar_select %p2718_p4, 1, 0 }
  0xbf   : > { %s3005_s23 = scalar_select %p2714_p2, 1, 0 }
  0xc0   : > { %s2723_s13 = scalar_select %p49_p13, %s2426_s29, %s51_s15  }
  0xc1   : > { %s3007_s16 = scalar_select %p2725_p9, 1, 0 }
  0xc2   : > { %s340_s14 = sand.u32 1, %s2426_s29   ;;  %s1786_s17 = sshll.u32 %s2434_s9, 7 }
  0xc3   : > { %s2732_s8 = sshll.u32 %s340_s14, 3  ;;  %s2737_s20 = scalar_lea.hbm %s2972_s0, %s1786_s17 }
  0xc4   : > { %s344_s22 = scalar_lea.vmem [#allocation2], %s2732_s8  ;;  %p2742_p10 = pnand %p2018_p5, %p2703_p11 }
  0xc5   : > { %s352_s25 = sshll.u32 %s344_s22, 4  ;;  %s2751_s19 = scalar_lea.hbm %s2973_s1, %s1786_s17  ;;  %s2746_s25 = int_to_ptr.vmem [resolvable:$true] %s352_s25 }
  0xc6   : > { %s341_s2 = scalar_lea.sflag [#allocation3], %s340_s14  ;;  %s2276_s3 = scalar_lea.hbm %s2737_s20, 128 }
  0xc7   : > { %p2277_p8 = scmp.ne.s32.totalorder %s2737_s20, %s2276_s3  ;;  %p2278_p1 = pneg %p2742_p10 }
  0xc8   : > { %s2281_s4 = scalar_lea.hbm %s2972_s0, 256  ;;  %p2282_p12 = scmp.lt.u32.totalorder %s2737_s20, %s2972_s0 }
  0xc9   : > { %p2279_p3 = pnand %p2278_p1, %p2277_p8  ;;  %p2283_p6 = scmp.lt.u32.totalorder %s2281_s4, %s2276_s3 }
  0xca   : > { %p2285_p0 = scmp.lt.u32.totalorder %s2276_s3, %s2737_s20 }
  0xcb   : > { %p2280_p11 = pneg %p2279_p3  ;;  %p2284_p13 = por %p2283_p6, %p2282_p12 }
  0xcd   : > { %p2286_p7 = por %p2285_p0, %p2284_p13 }
  0xcf   : > { %p2287_p5 = pnand %p2286_p7, %p2280_p11 }
  0xd1   : > { %2290 = shalt.err (!%p2287_p5)
}
  0xd2   : > { %s2291_s14 = scalar_lea.vmem %s2746_s25, 128  ;;  %s2448_s17 = smov [#allocation2]  }
  0xd3   : > { %p2292_p8 = scmp.ne.s32.totalorder %s2746_s25, %s2291_s14  ;;  %s2296_s21 = sshll.u32 %s2448_s17, 4  ;;  %s2297_s21 = int_to_ptr.vmem [resolvable:$false] %s2296_s21 }
  0xd4   : > { %s2298_s5 = scalar_lea.vmem %s2297_s21, 256  ;;  %p2299_p4 = scmp.lt.s32.totalorder %s2746_s25, %s2297_s21 }
  0xd5   : > { %p2294_p3 = pnand %p2292_p8, %p2278_p1  ;;  %p2300_p12 = scmp.lt.s32.totalorder %s2298_s5, %s2291_s14 }
  0xd7   : > { %p2295_p9 = pneg %p2294_p3  ;;  %p2301_p6 = por %p2300_p12, %p2299_p4 }
  0xd9   : > { %p2302_p13 = pnand %p2301_p6, %p2295_p9 }
  0xdb   : > { %2305 = shalt.err (!%p2302_p13)
}
  0xdc   : > { %2004 = dma.hbm_to_vmem [thread:$0]  (!%p2742_p10), %s2737_s20, 128, %s2746_s25, %s341_s2  }
  0xdd   : > { %s359_s3 = sand.u32 1, %s2438_s10   ;;  %s363_s4 = scalar_lea.vmem [#allocation5], %s2732_s8 }
  0xde   : > { %s370_s6 = sshll.u32 %s363_s4, 4  ;;  %s360_s24 = scalar_lea.sflag [#allocation6], %s359_s3  ;;  %s371_s6 = int_to_ptr.vmem [resolvable:$true] %s370_s6 }
  0xdf   : > { %s2306_s18 = scalar_lea.hbm %s2751_s19, 128  ;;  %s2311_s17 = scalar_lea.hbm %s2973_s1, 256 }
  0xe0   : > { %p2307_p4 = scmp.ne.s32.totalorder %s2751_s19, %s2306_s18  ;;  %p2312_p0 = scmp.lt.u32.totalorder %s2751_s19, %s2973_s1 }
  0xe1   : > { %p2313_p7 = scmp.lt.u32.totalorder %s2311_s17, %s2306_s18  ;;  %p2315_p8 = scmp.lt.u32.totalorder %s2306_s18, %s2751_s19 }
  0xe2   : > { %p2309_p9 = pnand %p2307_p4, %p2278_p1 }
  0xe3   : > { %p2314_p5 = por %p2313_p7, %p2312_p0 }
  0xe4   : > { %p2310_p11 = pneg %p2309_p9 }
  0xe5   : > { %p2316_p3 = por %p2315_p8, %p2314_p5 }
  0xe7   : > { %p2317_p12 = pnand %p2316_p3, %p2310_p11 }
  0xe9   : > { %2320 = shalt.err (!%p2317_p12)
}
  0xea   : > { %s2321_s2 = scalar_lea.vmem %s371_s6, 128  ;;  %s2449_s8 = smov [#allocation5]  }
  0xeb   : > { %p2322_p6 = scmp.ne.s32.totalorder %s371_s6, %s2321_s2  ;;  %s2326_s20 = sshll.u32 %s2449_s8, 4  ;;  %s2327_s20 = int_to_ptr.vmem [resolvable:$false] %s2326_s20 }
  0xec   : > { %s2328_s25 = scalar_lea.vmem %s2327_s20, 256  ;;  %p2329_p9 = scmp.lt.s32.totalorder %s371_s6, %s2327_s20 }
  0xed   : > { %p2324_p13 = pnand %p2322_p6, %p2278_p1  ;;  %p2330_p2 = scmp.lt.s32.totalorder %s2328_s25, %s2321_s2 }
  0xef   : > { %p2325_p4 = pneg %p2324_p13  ;;  %p2331_p0 = por %p2330_p2, %p2329_p9 }
  0xf1   : > { %p2332_p7 = pnand %p2331_p0, %p2325_p4 }
  0xf3   : > { %2335 = shalt.err (!%p2332_p7)
}
  0xf4   : > { %2007 = dma.hbm_to_vmem [thread:$0]  (!%p2742_p10), %s2751_s19, 128, %s371_s6, %s360_s24  }
  0xf5   : > { %p3009_p11 = scmp.ne.s32.totalorder %s2994_s12, 0 }
  0xf6   : > { %s2802_s3 = sand.u32 (!%p3009_p11), 1, %s2422_s28   ;;  %p3010_p2 = scmp.ne.s32.totalorder (!%p3009_p11), %s3005_s23, 0 }
  0xf7   : > { %379 = sbr.rel (%p3009_p11) target bundleno = 2397 (0x95d), region = 52  ;;  %s2805_s4 = sshll.u32 (!%p3009_p11), %s2802_s3, 3 }
  0xf8   : > { %s382_s18 = scalar_lea.sflag (!%p3009_p11), [#allocation3], %s2802_s3  ;;  %s385_s22 = scalar_lea.vmem (!%p3009_p11), [#allocation2], %s2805_s4 }
  0xfe   : > { %2389 = dma.done.wait (%p3010_p2), %s382_s18, 128  }
  0xff   : > { %2391 = vsyncadd (%p3010_p2), %s382_s18, 4294967168  ;;  %s390_s12 = sand.u32 1, %s2537_s11   ;;  %s394_s19 = scalar_lea.vmem [#allocation5], %s2805_s4 }
 0x100   : > { %s391_s15 = scalar_lea.sflag [#allocation6], %s390_s12 }
 0x101   : > { %2393 = dma.done.wait (%p3010_p2), %s391_s15, 128  }
 0x102   : > { %2395 = vsyncadd (%p3010_p2), %s391_s15, 4294967168  ;;  %p3011_p10 = scmp.eq.s32.totalorder %s2537_s11, 0 }
 0x104   : > { %2397 = dma.done.wait (%p3011_p10), [#allocation6], 512   ;;  %p3012_p1 = pmov %p3011_p10 }
 0x106   : > { %2399 = vsyncadd (%p3012_p1), [#allocation6], 4294966784  ;;  %p3013_p5 = pmov %p3012_p1 }
 0x107   : > { %p3014_p8 = pmov %p3012_p1 }
 0x108   : > { %2401 = dma.done.wait (%p3013_p5), [#allocation9], 1024  }
 0x109   : > { %2403 = vsyncadd (%p3014_p8), [#allocation9], 4294966272  ;;  %p3015_p3 = pmov %p3012_p1 }
 0x10a   : > { %p3016_p12 = pmov %p3012_p1 }
 0x10b   : > { %2405 = dma.done.wait (%p3015_p3), [#allocation12], 32  }
 0x10c   : > { %2407 = vsyncadd (%p3016_p12), [#allocation12], 4294967264  ;;  %p3017_p6 = pmov %p3012_p1 }
 0x10d   : > { %p3018_p13 = pmov %p3012_p1 }
 0x10e   : > { %2409 = dma.done.wait (%p3017_p6), [#allocation15], 16  }
 0x10f   : > { %2411 = vsyncadd (%p3018_p13), [#allocation15], 4294967280  ;;  %v2450_v0 = vmov 0.0|0.0   ;;  %vm2451_vm0 = vmmov 0   ;;  %v2452_v1 = vmov 0.0   ;;  %v543_v2 = vld [vmem:[#allocation8] sm:$0xff] }
 0x110   : > { %1946 = vmatprep.subr.bf16.mxu1 %v2450_v0  ;;  %1940 = vmatprep.subr.bf16.mxu0 %v2450_v0  ;;  %v544_v3 = vld [vmem:[#allocation8 + $0x8] sm:$0xff]  ;;  %v458_v4 = vld [vmem:[#allocation7] sm:$0xff]  ;;  %v545_v7 = vld [vmem:[#allocation8 + $0x10] sm:$0xff]  ;;  %vm469_vm1 = vcmask 261120   ;;  %vm627_vm2 = vcmask 64512   ;;  %s2453_s11 = smov 120  }
 0x111   : > { %1877 = vmatprep.mubr.msk.f32.mxu1 %vm2451_vm0, %v2452_v1  ;;  %1866 = vmatprep.mubr.msk.f32.mxu0 %vm2451_vm0, %v2452_v1  ;;  %v1947_v5 = vpack.c.bf16 %v544_v3, %v543_v2  ;;  %v459_v6 = vld [vmem:[#allocation7 + $0x8] sm:$0xff]  ;;  %v546_v8 = vld [vmem:[#allocation8 + $0x18] sm:$0xff]  ;;  %v460_v10 = vld [vmem:[#allocation7 + $0x10] sm:$0xff]  ;;  %s2454_s23 = smov 96   ;;  %s2455_s6 = smov 88  }
 0x112   : > { %v1941_v9 = vpack.c.bf16 %v459_v6, %v458_v4  ;;  %v461_v11 = vld [vmem:[#allocation7 + $0x18] sm:$0xff]  ;;  %v1950_v12 = vpack.c.bf16 %v546_v8, %v545_v7  ;;  %v456_v15 = vld [vmem:[%s385_s22] sm:$0xff]  ;;  %s2456_s24 = smov 112   ;;  %s2457_s14 = smov 104  }
 0x113   : > { %1948 = vmatpush3.bf16.msra.mxu1 %v1947_v5  ;;  %v1944_v13 = vpack.c.bf16 %v461_v11, %v460_v10  ;;  %v457_v14 = vld [vmem:[%s394_s19] sm:$0xff]  ;;  %v1801_v16 = vld [vmem:[#allocation13] ss:$0 sm:$0xff]  ;;  %v1799_v17 = vld [vmem:[#allocation11] ss:$0 sm:$0xff]  ;;  %s2458_s17 = smov 80  }
 0x114   : > { %1942 = vmatpush3.bf16.msra.mxu0 %v1941_v9  ;;  %1949 = vmatprep.subr.bf16.mxu1 %v2450_v0  ;;  %v792_v44 = vld [vmem:[#allocation10] sm:$0xff]  ;;  %v960_v47 = vld [vmem:[#allocation10 + $0x8] sm:$0xff]  ;;  %s2459_s21 = smov 72   ;;  %s3019_s5 = sld [smem:[#allocation24_spill]] }
 0x115   : > { %1943 = vmatprep.subr.bf16.mxu0 %v2450_v0  ;;  %s455_s8 = scalar_lea.vmem [#allocation16], %s2805_s4  ;;  %s3020_s22 = sld [smem:[#allocation30_spill]] }
 0x116   : > { %s1615_s20 = sshll.u32 %s455_s8, 4  ;;  %s1601_s15 = scalar_lea.sflag [#allocation4], %s2802_s3  ;;  %s2924_s20 = int_to_ptr.vmem [resolvable:$true] %s1615_s20 }
 0x117   : > { %1951 = vmatpush3.bf16.msra.mxu1 %v1950_v12  ;;  %s2336_s19 = scalar_lea.vmem %s2924_s20, 128  ;;  %p3021_p9 = scmp.ne.s32.totalorder %s3006_s26, 0 }
 0x118   : > { %1945 = vmatpush3.bf16.msra.mxu0 %v1944_v13  ;;  %1885 = vmatprep.subr.mxu1 %v2452_v1  ;;  %p2337_p4 = scmp.ne.s32.totalorder %s2924_s20, %s2336_s19  ;;  %s2460_s4 = smov [#allocation16]  }
 0x119   : > { %1880 = vmatprep.subr.mxu0 %v2452_v1 }
 0x11a   : > { %1878 = vmatmul.mubr.msk.f32.vlgmr.msra.gmra.mrb[0].mxu1 %vm469_vm1, %v457_v14  ;;  %v1274_v14 = vld [vmem:[#allocation10 + $0x10] sm:$0xff]  ;;  %s1821_s2 = sshll.u32 %s3019_s5, 7  ;;  %p2338_p0 = pnand %p2337_p4, %p3021_p9 }
 0x11b   : > { %1867 = vmatmul.mubr.msk.f32.vlgmr.msra.gmra.mrb[0].mxu0 %vm469_vm1, %v456_v15  ;;  %1887 = vmatprep.mubr.msk.f32.mxu1 %vm2451_vm0, %v2452_v1  ;;  %s2922_s12 = scalar_lea.hbm %s3020_s22, %s1821_s2 }
 0x11c   : > { %1882 = vmatprep.mubr.msk.f32.mxu0 %vm2451_vm0, %v2452_v1  ;;  %p2339_p7 = pneg %p2338_p0 }
 0x1ed   : > { %v623_v18 = vpop.f32.mrb[0].mxu1 }
 0x1ee   : > { %v2851_v19 = vadd.f32 %v1801_v16, %v623_v18  ;;  %v1879_v20 = vpop.f32.mrb[1].mxu1  ;;  %v539_v21 = vpop.f32.mrb[0].mxu0 }
 0x1ef   : > { %v540_v22 = vadd.f32 %v1799_v17, %v539_v21  ;;  %v1868_v23 = vpop.f32.mrb[1].mxu0 }
 0x1f0   : > { %795 = vrot.lane.b32.xlu0 %v2851_v19, %s2453_s11  ;;  %1881 = vmatpush3.xpose.msk.msra.mxu0 %vm627_vm2, %v2851_v19 }
 0x1f1   : > { %1890 = vmatprep.subr.mxu0 %v2452_v1 }
 0x1f3   : > { %1883 = vmatmul.mubr.msk.f32.vlgmr.msra.gmra.mrb[2].mxu0 %vm627_vm2, %v540_v22 }
 0x1f4   : > { %793 = vrot.lane.b32.xlu0 %v540_v22, %s2453_s11  ;;  %1892 = vmatprep.mubr.msk.f32.mxu0 %vm2451_vm0, %v2452_v1  ;;  %s2340_s11 = sshll.u32 %s2460_s4, 4  ;;  %s2341_s11 = int_to_ptr.vmem [resolvable:$false] %s2340_s11 }
 0x1f5   : > { %p2343_p11 = scmp.lt.s32.totalorder %s2924_s20, %s2341_s11 }
 0x1f8   : > { %714 = vrot.lane.b32.xlu0 %v2851_v19, %s2454_s23  ;;  %s2342_s23 = scalar_lea.vmem %s2341_s11, 256 }
 0x1f9   : > { %p2344_p2 = scmp.lt.s32.totalorder %s2342_s23, %s2336_s19 }
 0x1fb   : > { %p2345_p10 = por %p2344_p2, %p2343_p11 }
 0x1fd   : > { %p2346_p1 = pnand %p2345_p10, %p2339_p7 }
 0x262   : > { %v796_v24 = vpop.permute.xlu0 %795 }
 0x263   : > { %1891 = vmatpush3.xpose.msk.msra.mxu0 %vm627_vm2, %v796_v24 }
 0x264   : > { %1900 = vmatprep.subr.mxu0 %v2452_v1 }
 0x266   : > { %v794_v25 = vpop.permute.xlu0 %793 }
 0x267   : > { %1893 = vmatmul.mubr.msk.f32.vlgmr.msra.gmra.mrb[4].mxu0 %vm627_vm2, %v794_v25 }
 0x268   : > { %1902 = vmatprep.mubr.msk.f32.mxu0 %vm2451_vm0, %v2452_v1  ;;  %1901 = vmatpush3.msra.mxu0 %v960_v47 }
 0x269   : > { %1910 = vmatprep.subr.mxu0 %v2452_v1 }
 0x26a   : > { %v715_v26 = vpop.permute.xlu0 %714 }
 0x26b   : > { %1886 = vmatpush3.msra.mxu1 %v715_v26 }
 0x26c   : > { %1895 = vmatprep.subr.mxu1 %v2452_v1 }
 0x2c6   : > { %v700_v27 = vpop.f32.mrb[2].mxu0 }
 0x2c7   : > { %v704_v28 = vmul.f32 0.35355338, %v700_v27  ;;  %v1884_v29 = vpop.f32.mrb[3].mxu0 }
 0x2c9   : > { %v705_v30 = vsel %vm627_vm2, %v704_v28, -inf }
 0x2ca   : > { %706 = vmax.xlane.f32.xlu1 %v705_v30  ;;  %v1516_v30 = vld [vmem:[#allocation10 + $0x18] sm:$0xff] }
 0x33a   : > { %v867_v31 = vpop.f32.mrb[4].mxu0 }
 0x33b   : > { %v871_v32 = vmul.f32 0.35355338, %v867_v31  ;;  %v1894_v33 = vpop.f32.mrb[5].mxu0 }
 0x33d   : > { %v872_v34 = vsel %vm627_vm2, %v871_v32, -inf }
 0x33e   : > { %873 = vmax.xlane.f32.xlu1 %v872_v34 }
 0x34f   : > { %881 = vrot.lane.b32.xlu1 %v2851_v19, %s2455_s6 }
 0x353   : > { %1109 = vrot.lane.b32.xlu1 %v2851_v19, %s2456_s24 }
 0x357   : > { %v707_v35 = vpop.xlane.xlu1 %706  ;;  %1107 = vrot.lane.b32.xlu1 %v540_v22, %s2456_s24 }
 0x358   : > { %v708_v36 = vsub.f32 %v704_v28, %v707_v35 }
 0x35a   : > { %v709_v37 = vmul.f32 1.442695, %v708_v36 }
 0x35c   : > { %2092 = vpow2.f32 %v709_v37 }
 0x366   : > { %v2093_v38 = vpop.eup %2092 }
 0x367   : > { %1888 = vmatmul.mubr.msk.f32.vlgmr.msra.gmra.mrb[2].mxu1 %vm627_vm2, %v2093_v38  ;;  %v711_v39 = vsel %vm627_vm2, %v2093_v38, 0.0 }
 0x368   : > { %1897 = vmatprep.mubr.msk.f32.mxu1 %vm2451_vm0, %v2452_v1 }
 0x37b   : > { %712 = vadd.xlane.f32.xlu1 %v711_v39  ;;  %v1819_v39 = vld [vmem:[#allocation14] ss:$0 sm:$0xff] }
 0x38c   : > { %1349 = vrot.lane.b32.xlu1 %v540_v22, %s2457_s14 }
 0x3cb   : > { %v874_v40 = vpop.xlane.xlu1 %873 }
 0x3cc   : > { %v875_v41 = vsub.f32 %v871_v32, %v874_v40 }
 0x3ce   : > { %v876_v42 = vmul.f32 1.442695, %v875_v41 }
 0x3cf   : > { %v882_v43 = vpop.permute.xlu1 %881 }
 0x3d0   : > { %2094 = vpow2.f32 %v876_v42  ;;  %1896 = vmatpush3.msra.mxu1 %v882_v43 }
 0x3d1   : > { %1905 = vmatprep.subr.mxu1 %v2452_v1 }
 0x3d3   : > { %v1110_v48 = vpop.permute.xlu1 %1109 }
 0x3d7   : > { %v1108_v49 = vpop.permute.xlu1 %1107 }
 0x3da   : > { %v2095_v45 = vpop.eup %2094 }
 0x3db   : > { %1898 = vmatmul.mubr.msk.f32.vlgmr.msra.gmra.mrb[4].mxu1 %vm627_vm2, %v2095_v45  ;;  %v878_v46 = vsel %vm627_vm2, %v2095_v45, 0.0 }
 0x3dc   : > { %879 = vadd.xlane.f32.xlu0 %v878_v46  ;;  %1906 = vmatpush3.msra.mxu1 %v792_v44 }
 0x3dd   : > { %1907 = vmatprep.mubr.msk.f32.mxu1 %vm2451_vm0, %v2452_v1  ;;  %1915 = vmatprep.subr.mxu1 %v2452_v1 }
 0x3f2   : > { %1195 = vrot.lane.b32.xlu0 %v2851_v19, %s2458_s17 }
 0x408   : > { %v713_v50 = vpop.xlane.xlu1 %712 }
 0x409   : > { %2096 = vrcp.f32 %v713_v50 }
 0x40c   : > { %v1350_v13 = vpop.permute.xlu1 %1349 }
 0x413   : > { %v2097_v51 = vpop.eup %2096 }
 0x43a   : > { %v786_v52 = vpop.f32.mrb[2].mxu1 }
 0x43b   : > { %v791_v53 = vmul.f32 %v2097_v51, %v786_v52  ;;  %v1889_v54 = vpop.f32.mrb[3].mxu1 }
 0x43d   : > { %1908 = vmatmul.mubr.msk.f32.vlgmr.msra.gmra.mrb[6].mxu1 %vm627_vm2, %v791_v53 }
 0x43e   : > { %1917 = vmatprep.mubr.msk.f32.mxu1 %vm2451_vm0, %v2452_v1 }
 0x469   : > { %v880_v55 = vpop.xlane.xlu0 %879 }
 0x46a   : > { %2098 = vrcp.f32 %v880_v55 }
 0x46d   : > { %v1196_v56 = vpop.permute.xlu0 %1195 }
 0x46e   : > { %1916 = vmatpush3.msra.mxu1 %v1196_v56 }
 0x46f   : > { %1925 = vmatprep.subr.mxu1 %v2452_v1 }
 0x474   : > { %v2099_v57 = vpop.eup %2098 }
 0x4ae   : > { %v953_v58 = vpop.f32.mrb[4].mxu1 }
 0x4af   : > { %v958_v59 = vmul.f32 %v2099_v57, %v953_v58  ;;  %v1899_v60 = vpop.f32.mrb[5].mxu1 }
 0x4b1   : > { %1903 = vmatmul.mubr.msk.f32.vlgmr.msra.gmra.mrb[6].mxu0 %vm627_vm2, %v958_v59 }
 0x4b2   : > { %1911 = vmatpush3.xpose.msk.msra.mxu0 %vm627_vm2, %v1110_v48  ;;  %1912 = vmatprep.mubr.msk.f32.mxu0 %vm2451_vm0, %v2452_v1 }
 0x4b3   : > { %1920 = vmatprep.subr.mxu0 %v2452_v1 }
 0x4b5   : > { %1913 = vmatmul.mubr.msk.f32.vlgmr.msra.gmra.mrb[8].mxu0 %vm627_vm2, %v1108_v49 }
 0x4b6   : > { %1922 = vmatprep.mubr.msk.f32.mxu0 %vm2451_vm0, %v2452_v1  ;;  %1921 = vmatpush3.msra.mxu0 %v1274_v14 }
 0x4b7   : > { %1930 = vmatprep.subr.mxu0 %v2452_v1 }
 0x510   : > { %v1103_v61 = vpop.f32.mrb[6].mxu1 }
 0x511   : > { %v1909_v62 = vpop.f32.mrb[7].mxu1 }
 0x584   : > { %v1030_v63 = vpop.f32.mrb[6].mxu0 }
 0x585   : > { %v1104_v0 = vadd.f32 %v1103_v61, %v1030_v63  ;;  %v1904_v2 = vpop.f32.mrb[7].mxu0 }
 0x588   : > { %v1181_v3 = vpop.f32.mrb[8].mxu0 }
 0x589   : > { %v1185_v4 = vmul.f32 0.35355338, %v1181_v3  ;;  %v1914_v5 = vpop.f32.mrb[9].mxu0 }
 0x58b   : > { %v1186_v6 = vsel %vm627_vm2, %v1185_v4, -inf }
 0x58c   : > { %1187 = vmax.xlane.f32.xlu0 %v1186_v6 }
 0x5a2   : > { %1351 = vrot.lane.b32.xlu0 %v2851_v19, %s2457_s14 }
 0x619   : > { %v1188_v7 = vpop.xlane.xlu0 %1187 }
 0x61a   : > { %v1189_v8 = vsub.f32 %v1185_v4, %v1188_v7 }
 0x61c   : > { %v1190_v9 = vmul.f32 1.442695, %v1189_v8 }
 0x61d   : > { %v1352_v11 = vpop.permute.xlu0 %1351 }
 0x61e   : > { %2100 = vpow2.f32 %v1190_v9 }
 0x628   : > { %v2101_v10 = vpop.eup %2100 }
 0x629   : > { %1918 = vmatmul.mubr.msk.f32.vlgmr.msra.gmra.mrb[8].mxu1 %vm627_vm2, %v2101_v10  ;;  %v1192_v12 = vsel %vm627_vm2, %v2101_v10, 0.0 }
 0x62a   : > { %1926 = vmatpush3.xpose.msk.msra.mxu1 %vm627_vm2, %v1352_v11  ;;  %1193 = vadd.xlane.f32.xlu0 %v1192_v12 }
 0x62b   : > { %1927 = vmatprep.mubr.msk.f32.mxu1 %vm2451_vm0, %v2452_v1  ;;  %1935 = vmatprep.subr.mxu1 %v2452_v1 }
 0x62d   : > { %1928 = vmatmul.mubr.msk.f32.vlgmr.msra.gmra.mrb[10].mxu1 %vm627_vm2, %v1350_v13 }
 0x62e   : > { %1937 = vmatprep.mubr.msk.f32.mxu1 %vm2451_vm0, %v2452_v1  ;;  %1936 = vmatpush3.msra.mxu1 %v1516_v30 }
 0x640   : > { %1437 = vrot.lane.b32.xlu0 %v2851_v19, %s2459_s21 }
 0x6b7   : > { %v1194_v15 = vpop.xlane.xlu0 %1193 }
 0x6b8   : > { %2102 = vrcp.f32 %v1194_v15 }
 0x6bb   : > { %v1438_v21 = vpop.permute.xlu0 %1437 }
 0x6c2   : > { %v2103_v16 = vpop.eup %2102 }
 0x6fc   : > { %v1267_v17 = vpop.f32.mrb[8].mxu1 }
 0x6fd   : > { %v1272_v18 = vmul.f32 %v2103_v16, %v1267_v17  ;;  %v1919_v20 = vpop.f32.mrb[9].mxu1 }
 0x6ff   : > { %1923 = vmatmul.mubr.msk.f32.vlgmr.msra.gmra.mrb[10].mxu0 %vm627_vm2, %v1272_v18 }
 0x700   : > { %1931 = vmatpush3.msra.mxu0 %v1438_v21  ;;  %v1423_v22 = vpop.f32.mrb[10].mxu1  ;;  %1932 = vmatprep.mubr.msk.f32.mxu0 %vm2451_vm0, %v2452_v1 }
 0x701   : > { %v1427_v23 = vmul.f32 0.35355338, %v1423_v22  ;;  %v1929_v19 = vpop.f32.mrb[11].mxu1 }
 0x703   : > { %v1428_v24 = vsel %vm627_vm2, %v1427_v23, -inf }
 0x704   : > { %1429 = vmax.xlane.f32.xlu1 %v1428_v24 }
 0x791   : > { %v1430_v25 = vpop.xlane.xlu1 %1429 }
 0x792   : > { %v1431_v26 = vsub.f32 %v1427_v23, %v1430_v25 }
 0x794   : > { %v1432_v27 = vmul.f32 1.442695, %v1431_v26 }
 0x796   : > { %2104 = vpow2.f32 %v1432_v27 }
 0x7a0   : > { %v2105_v28 = vpop.eup %2104 }
 0x7a1   : > { %1933 = vmatmul.mubr.msk.f32.vlgmr.msra.gmra.mrb[12].mxu0 %vm627_vm2, %v2105_v28  ;;  %v1434_v29 = vsel %vm627_vm2, %v2105_v28, 0.0 }
 0x7a2   : > { %1435 = vadd.xlane.f32.xlu1 %v1434_v29 }
 0x7d2   : > { %v1344_v1 = vpop.f32.mrb[10].mxu0 }
 0x7d3   : > { %v1348_v31 = vadd.f32 %v1344_v1, %v1104_v0  ;;  %v1924_v32 = vpop.f32.mrb[11].mxu0 }
 0x82f   : > { %v1436_v33 = vpop.xlane.xlu1 %1435 }
 0x830   : > { %2106 = vrcp.f32 %v1436_v33 }
 0x83a   : > { %v2107_v34 = vpop.eup %2106 }
 0x874   : > { %v1509_v35 = vpop.f32.mrb[12].mxu0 }
 0x875   : > { %v1514_v36 = vmul.f32 %v2107_v34, %v1509_v35  ;;  %v1934_v37 = vpop.f32.mrb[13].mxu0 }
 0x877   : > { %1938 = vmatmul.mubr.msk.f32.vlgmr.msra.gmra.mrb[12].mxu1 %vm627_vm2, %v1514_v36 }
 0x94a   : > { %v1586_v38 = vpop.f32.mrb[12].mxu1 }
 0x94b   : > { %v1590_v40 = vadd.f32 %v1586_v38, %v1348_v31  ;;  %v1939_v41 = vpop.f32.mrb[13].mxu1 }
 0x94d   : > { %v1598_v42 = vadd.f32 %v1819_v39, %v1590_v40 }
 0x94f   : > { %1599 = vst.msk [vmem:[%s455_s8] sm:$0xff] %vm469_vm1, %v1598_v42 }
 0x950   : > { %2349 = shalt.err (!%p2346_p1)
}
 0x951   : > { %s2350_s3 = scalar_lea.hbm %s2922_s12, 128  ;;  %s2354_s14 = scalar_lea.hbm %s3020_s22, 256 }
 0x952   : > { %p2351_p5 = scmp.ne.s32.totalorder %s2922_s12, %s2350_s3  ;;  %p2355_p12 = scmp.lt.u32.totalorder %s2922_s12, %s3020_s22 }
 0x953   : > { %p2356_p6 = scmp.lt.u32.totalorder %s2354_s14, %s2350_s3  ;;  %p2358_p4 = scmp.lt.u32.totalorder %s2350_s3, %s2922_s12 }
 0x954   : > { %p2352_p8 = pnand %p2351_p5, %p3021_p9 }
 0x955   : > { %p2357_p13 = por %p2356_p6, %p2355_p12 }
 0x956   : > { %p2353_p3 = pneg %p2352_p8 }
 0x957   : > { %p2359_p0 = por %p2358_p4, %p2357_p13 }
 0x959   : > { %p2360_p7 = pnand %p2359_p0, %p2353_p3 }
 0x95b   : > { %2363 = shalt.err (!%p2360_p7)
}
 0x95c   : > { %1980 = dma.vmem_to_hbm [thread:$0]  (%p3021_p9), %s2924_s20, 128, %s2922_s12, %s1601_s15  }
 0x95d PF: > { %s1627_s5 = sand.u32 1, %s2418_s27   ;;  %p3022_p11 = scmp.ne.s32.totalorder %s3007_s16, 0 }
 0x95e   : > { %p3023_p2 = scmp.ge.s32.totalorder %s2438_s10, 2  ;;  %s1628_s2 = scalar_lea.sflag [#allocation4], %s1627_s5 }
 0x960   : > { %p2009_p10 = pnand %p3023_p2, %p3022_p11 }
 0x962   : > { %2413 = dma.done.wait (!%p2009_p10), %s1628_s2, 128  }
 0x963   : > { %2415 = vsyncadd (!%p2009_p10), %s1628_s2, 4294967168  ;;  %s30_s10 = sadd.s32 1, %s2438_s10   ;;  %s3024_s26 = smov %s3031_s30 }
 0x964   : > { %p27_p1 = scmp.ge.s32.totalorder %s30_s10, 4   ;;  %s3025_s27 = smov %s2422_s28 }
 0x965   : > { %s3026_s28 = smov %s2426_s29  ;;  %s3027_s29 = smov %s2723_s13 }
 0x966   : > { %s3028_s30 = smov %s2434_s9  ;;  %s3029_s9 = smov %s3024_s26 }
 0x967   :  { %29 = sbr.rel (!%p27_p1) target bundleno = 18 (0x12), region = 137 }
 0x96e   :  { %1633 = vsyncpa [#allocation3], 1 }
 0x96f   :  { %1635 = vsyncpa [#allocation3 + $0x1], 1 }
 0x970   :  { %1636 = vsyncpa [#allocation6], 1 }
 0x971   :  { %1638 = vsyncpa [#allocation6 + $0x1], 1 }
 0x972   :  { %1639 = vsyncpa [#allocation9], 1 }
 0x973   :  { %1640 = vsyncpa [#allocation12], 1 }
 0x974   :  { %1641 = vsyncpa [#allocation15], 1 }
 0x975   :  { %1642 = vsyncpa [#allocation4], 1 }
 0x976   :  { %1644 = vsyncpa [#allocation4 + $0x1], 1 }

</bundles_post_ra>
